<compile_context>
chip_gen: v7x
topology: tpu7x:2x2x1
jax: 0.10.0
libtpu: 0.0.40
codegen_flags: <defaults>
</compile_context>

<pallas_src>
import jax
import jax.numpy as jnp
from jax.experimental import pallas as pl
from jax.experimental.pallas import tpu as pltpu


def _round_up(v, m):
    return ((v + m - 1) // m) * m


def _vmem_capacity_bytes():
    # Generation-aware VMEM: v7x has 64 MiB/TC, v5e/v6e have 128 MiB. Fall back to
    # the most conservative (v7x) figure if the query is unavailable.
    try:
        return int(pltpu.get_tpu_info().vmem_capacity_bytes)
    except Exception:
        return 64 << 20


def _choose_spatial_tile(hw, n, c_in, c_out, itemsize, vmem_cap):
    """Pick the spatial (lane) tile width.

    Largest 128-multiple tile whose double-buffered x + out blocks fit ~1/4 of
    physical VMEM (capped at 16K lanes: >=512 lanes already sits near the HBM
    roofline and the cap bounds in-kernel unrolling). Grid uses cdiv, so the tile
    does not need to divide H*W. Guarantees >=2 total grid steps when possible so
    both v7x TensorCores are used.
    """
    if hw <= 128:
        return hw  # full extent; legal block even if not a multiple of 128
    budget = max(vmem_cap // 4, 4 << 20)
    per_lane = 2 * (c_in + c_out) * itemsize  # double-buffered x + out blocks
    max_tw = max(128, (budget // per_lane) // 128 * 128)
    max_tw = min(max_tw, 16384)
    tw = min(max_tw, _round_up(hw, 128))
    # Megacore: ensure the grid has at least 2 steps (v7x has 2 TCs per chip).
    if n * pl.cdiv(hw, tw) < 2:
        tw = max(128, _round_up(pl.cdiv(hw, 2), 128))
    return tw


def _make_conv_block_kernel(negative_slope, use_vpu, precision):
    slope = float(negative_slope)

    def kernel(x_ref, w_ref, o_ref):
        # x_ref: (1, C_in, tw)   w_ref: (C_out, C_in)   o_ref: (1, C_out, tw)
        c_in = x_ref.shape[1]
        tw = x_ref.shape[2]

        if use_vpu:
            # Tiny contraction (K << 128): unrolled broadcast-scaled-row sum on
            # the VPU avoids MXU pipeline fill. Process the lane axis in 512-lane
            # slabs so the f32 working set stays in vregs (no VMEM spills that
            # would compete with the DMA pipeline).
            wf = w_ref[...].astype(jnp.float32)  # hoisted out of the slab loop
            start = 0
            while start < tw:
                size = min(512, tw - start)
                xs = x_ref[0, :, start:start + size].astype(jnp.float32)
                h = wf[:, 0:1] * xs[0:1, :]
                for ci in range(1, c_in):
                    h = h + wf[:, ci:ci + 1] * xs[ci:ci + 1, :]
                h = jnp.where(h >= 0.0, h, slope * h)  # LeakyReLU(slope)
                o_ref[0, :, start:start + size] = h.astype(o_ref.dtype)
                start += size
        else:
            h = jnp.dot(w_ref[...], x_ref[0],
                        preferred_element_type=jnp.float32,
                        precision=precision)
            h = jnp.where(h >= 0.0, h, slope * h)
            o_ref[0] = h.astype(o_ref.dtype)

    return kernel


def conv_block_forward(x_nchw, w, *, negative_slope=0.2):
    """ConvBlock forward: 1x1 conv (no bias, padding=0) followed by LeakyReLU.

    x_nchw: (N, C_in, H, W)
    w:      (C_out, C_in)  -- PyTorch (C_out, C_in, 1, 1) with trailing 1s squeezed
    """
    N, C_in, H, W = x_nchw.shape
    C_out = w.shape[0]
    HW = H * W
    dtype = x_nchw.dtype
    itemsize = jnp.dtype(dtype).itemsize

    # NCHW -> (N, C_in, H*W): channels on sublanes, flattened spatial on lanes.
    # No HBM-side padding and no post-call slicing.
    x = x_nchw.reshape(N, C_in, HW)
    w_x = w.astype(dtype)  # module keeps weights & activations in one dtype

    vmem_cap = _vmem_capacity_bytes()
    tw = _choose_spatial_tile(HW, N, C_in, C_out, itemsize, vmem_cap)
    grid = (N, pl.cdiv(HW, tw))

    # VMEM request: double-buffered x + out blocks, the (resident, tiny) weight
    # block, plus headroom; capped at 3/4 of this generation's physical VMEM.
    needed = 2 * (C_in + C_out) * tw * itemsize + 2 * C_out * C_in * itemsize
    vmem_bytes = int(min(needed + (8 << 20), (vmem_cap * 3) // 4))

    use_vpu = C_in <= 32
    precision = (jax.lax.Precision.HIGHEST
                 if jnp.dtype(dtype) == jnp.dtype(jnp.float32) else None)
    kernel = _make_conv_block_kernel(negative_slope, use_vpu, precision)

    out = pl.pallas_call(
        kernel,
        out_shape=jax.ShapeDtypeStruct((N, C_out, HW), dtype),
        grid_spec=pltpu.PrefetchScalarGridSpec(
            num_scalar_prefetch=0,
            grid=grid,  # (batch, spatial tiles) -- both independent
            in_specs=[
                pl.BlockSpec((1, C_in, tw), lambda n, s: (n, 0, s)),
                pl.BlockSpec((C_out, C_in), lambda n, s: (0, 0)),
            ],
            out_specs=pl.BlockSpec((1, C_out, tw), lambda n, s: (n, 0, s)),
        ),
        compiler_params=pltpu.CompilerParams(
            dimension_semantics=("parallel", "parallel"),
            vmem_limit_bytes=vmem_bytes,
        ),
    )(x, w_x)

    return out.reshape(N, C_out, H, W)


if __name__ == "__main__":
    key = jax.random.PRNGKey(0)
    k_x, k_w = jax.random.split(key)

    N, C_in, C_out, H, W = 2, 4, 8, 16, 16
    x = jax.random.normal(k_x, (N, C_in, H, W), dtype=jnp.float32)

    # Synthetic 1x1 conv weight, PyTorch (C_out, C_in, 1, 1) squeezed to (C_out, C_in).
    bound = 1.0 / (C_in ** 0.5)  # kaiming-uniform-ish scale (fan_in = C_in * 1 * 1)
    w = jax.random.uniform(k_w, (C_out, C_in), jnp.float32, -bound, bound)

    out = conv_block_forward(x, w)
    jax.block_until_ready(out)

    assert out.shape == (N, C_out, H, W)
    assert out.dtype == x.dtype

    # Reference: conv1x1 (no bias) -> LeakyReLU(0.2) in plain JAX.
    ref = jnp.einsum("oc,nchw->nohw", w, x, precision=jax.lax.Precision.HIGHEST)
    ref = jnp.where(ref >= 0.0, ref, 0.2 * ref)
    assert jnp.allclose(out, ref, atol=1e-4, rtol=1e-4), float(jnp.max(jnp.abs(out - ref)))

    print("KERNEL_OK")
</pallas_src>

<mosaic_0001>
module attributes {stable_mosaic.version = 11 : i64} {
  func.func @kernel(%arg0: i32, %arg1: i32, %arg2: memref<1x4x256xf32, #tpu.memory_space<vmem>>, %arg3: memref<8x4xf32, #tpu.memory_space<vmem>>, %arg4: memref<1x8x256xf32, #tpu.memory_space<vmem>>) attributes {dimension_semantics = [#tpu.dimension_semantics<parallel>, #tpu.dimension_semantics<parallel>], iteration_bounds = array<i64: 2, 1>, scalar_prefetch = 0 : i64, scratch_operands = 0 : i64, tpu.core_type = #tpu.core_type<tc>, window_params = [{transform_indices = @transform_0, window_bounds = array<i64: 1, 4, 256>}, {pipeline_mode = #tpu.pipeline_mode<synchronous>, transform_indices = @transform_1, window_bounds = array<i64: 8, 4>}, {transform_indices = @transform_2, window_bounds = array<i64: 1, 8, 256>}]} {
    %c0 = arith.constant 0 : index
    %c0_0 = arith.constant 0 : index
    %0 = vector.load %arg3[%c0, %c0_0] : memref<8x4xf32, #tpu.memory_space<vmem>>, vector<8x4xf32>
    %c0_1 = arith.constant 0 : index
    %c0_2 = arith.constant 0 : index
    %c0_3 = arith.constant 0 : index
    %1 = vector.load %arg2[%c0_1, %c0_2, %c0_3] : memref<1x4x256xf32, #tpu.memory_space<vmem>>, vector<1x4x256xf32>
    %2 = vector.shape_cast %1 : vector<1x4x256xf32> to vector<4x256xf32>
    %3 = vector.extract_strided_slice %0 {offsets = [0, 0], sizes = [8, 1], strides = [1, 1]} : vector<8x4xf32> to vector<8x1xf32>
    %4 = vector.extract_strided_slice %2 {offsets = [0, 0], sizes = [1, 256], strides = [1, 1]} : vector<4x256xf32> to vector<1x256xf32>
    %5 = vector.broadcast %3 : vector<8x1xf32> to vector<8x256xf32>
    %6 = vector.broadcast %4 : vector<1x256xf32> to vector<8x256xf32>
    %7 = arith.mulf %5, %6 : vector<8x256xf32>
    %8 = vector.extract_strided_slice %0 {offsets = [0, 1], sizes = [8, 1], strides = [1, 1]} : vector<8x4xf32> to vector<8x1xf32>
    %9 = vector.extract_strided_slice %2 {offsets = [1, 0], sizes = [1, 256], strides = [1, 1]} : vector<4x256xf32> to vector<1x256xf32>
    %10 = vector.broadcast %8 : vector<8x1xf32> to vector<8x256xf32>
    %11 = vector.broadcast %9 : vector<1x256xf32> to vector<8x256xf32>
    %12 = arith.mulf %10, %11 : vector<8x256xf32>
    %13 = arith.addf %7, %12 : vector<8x256xf32>
    %14 = vector.extract_strided_slice %0 {offsets = [0, 2], sizes = [8, 1], strides = [1, 1]} : vector<8x4xf32> to vector<8x1xf32>
    %15 = vector.extract_strided_slice %2 {offsets = [2, 0], sizes = [1, 256], strides = [1, 1]} : vector<4x256xf32> to vector<1x256xf32>
    %16 = vector.broadcast %14 : vector<8x1xf32> to vector<8x256xf32>
    %17 = vector.broadcast %15 : vector<1x256xf32> to vector<8x256xf32>
    %18 = arith.mulf %16, %17 : vector<8x256xf32>
    %19 = arith.addf %13, %18 : vector<8x256xf32>
    %20 = vector.extract_strided_slice %0 {offsets = [0, 3], sizes = [8, 1], strides = [1, 1]} : vector<8x4xf32> to vector<8x1xf32>
    %21 = vector.extract_strided_slice %2 {offsets = [3, 0], sizes = [1, 256], strides = [1, 1]} : vector<4x256xf32> to vector<1x256xf32>
    %22 = vector.broadcast %20 : vector<8x1xf32> to vector<8x256xf32>
    %23 = vector.broadcast %21 : vector<1x256xf32> to vector<8x256xf32>
    %24 = arith.mulf %22, %23 : vector<8x256xf32>
    %25 = arith.addf %19, %24 : vector<8x256xf32>
    %cst = arith.constant 0.000000e+00 : f32
    %26 = vector.broadcast %cst : f32 to vector<8x256xf32>
    %27 = arith.cmpf oge, %25, %26 : vector<8x256xf32>
    %cst_4 = arith.constant 2.000000e-01 : f32
    %28 = vector.broadcast %cst_4 : f32 to vector<8x256xf32>
    %29 = arith.mulf %28, %25 : vector<8x256xf32>
    %30 = arith.select %27, %25, %29 : vector<8x256xi1>, vector<8x256xf32>
    %c0_5 = arith.constant 0 : index
    %c0_6 = arith.constant 0 : index
    %c0_7 = arith.constant 0 : index
    %31 = vector.load %arg4[%c0_5, %c0_6, %c0_7] : memref<1x8x256xf32, #tpu.memory_space<vmem>>, vector<1x8x256xf32>
    %32 = vector.shape_cast %31 : vector<1x8x256xf32> to vector<8x256xf32>
    %33 = vector.shape_cast %30 : vector<8x256xf32> to vector<1x8x256xf32>
    tpu.vector_store %arg4[%c0_5, %c0_6, %c0_7], %33 {strides = array<i32>} : memref<1x8x256xf32, #tpu.memory_space<vmem>>, vector<1x8x256xf32>,
    return
  }
  func.func @transform_0(%arg0: i32, %arg1: i32) -> (i32, i32, i32) {
    %c0_i32 = arith.constant 0 : i32
    %c0_i32_0 = arith.constant 0 : i32
    return %arg0, %c0_i32, %arg1 : i32, i32, i32
  }
  func.func @transform_1(%arg0: i32, %arg1: i32) -> (i32, i32) {
    %c0_i32 = arith.constant 0 : i32
    %c0_i32_0 = arith.constant 0 : i32
    %c0_i32_1 = arith.constant 0 : i32
    return %c0_i32, %c0_i32_0 : i32, i32
  }
  func.func @transform_2(%arg0: i32, %arg1: i32) -> (i32, i32, i32) {
    %c0_i32 = arith.constant 0 : i32
    %c0_i32_0 = arith.constant 0 : i32
    return %arg0, %c0_i32, %arg1 : i32, i32, i32
  }
}

</mosaic_0001>

<bundles_post_ra>
// kernel: tpu_custom_call.1
= control target key start
LH: loop header
LB: loop body
LE: loop exit
PB: predicated region body
PF: predicated region fallthrough
CT: control target
= control target key end

     0   :  { %7 = vsyncpa [#allocation3], 0  ;;  %s794_s0 = inlined_call_operand.hbm [shape: f32[2,4,256], index: 0, kind: input, shape index: {}]   ;;  %s795_s1 = inlined_call_operand.vmem [shape: f32[8,4], index: 1, kind: input, shape index: {}]   ;;  %s796_s2 = inlined_call_operand.hbm [shape: f32[2,8,256], index: 2, kind: output, shape index: {}]  }
   0x1   :  { %9 = vsyncpa [#allocation3 + $0x1], 0 }
   0x2   :  { %10 = vsyncpa [#allocation4], 0 }
   0x3   :  { %12 = vsyncpa [#allocation4 + $0x1], 0  ;;  %s618_s9 = smov 0   ;;  %s620_s10 = smov 0  }
   0x4   :  { %s622_s11 = smov 0   ;;  %s624_s12 = smov 0  }
   0x5   :  { %s626_s13 = smov 0   ;;  %s628_s14 = smov 0  }
   0x6 LB: > { %s395_s15 = sadd.s32 4294967295, %s595_s14   ;;  %s396_s16 = sadd.s32 4294967294, %s595_s14   ;;  %s595_s14 = sphi %s628_s14, %s18_s14   ;;  %s591_s13 = sphi %s626_s13, %s812_s13   ;;  %s587_s12 = sphi %s624_s12, %s811_s12   ;;  %s583_s11 = sphi %s622_s11, %s810_s11   ;;  %s579_s10 = sphi %s620_s10, %s809_s10   ;;  %s575_s9 = sphi %s618_s9, %s808_s9  }
   0x7   : > { %s30_s17 = sadd.s32 1, %s591_s13  ;;  %s39_s18 = sadd.s32 1, %s583_s11 }
   0x8   : > { %p32_p0 = scmp.ge.s32.totalorder %s30_s17, 2  ;;  %p46_p1 = scmp.ne.s32.totalorder %s583_s11, %s579_s10 }
   0x9   : > { %p47_p2 = scmp.eq.s32.totalorder %s595_s14, 0  ;;  %p52_p3 = scmp.ne.s32.totalorder %s579_s10, %s575_s9 }
   0xa   : > { %s814_s17 = smov (%p32_p0, %s30_s17), 0  ;;  %p53_p5 = scmp.eq.s32.totalorder %s395_s15, 0 }
   0xb   : > { %p659_p4 = por %p47_p2, %p46_p1  ;;  %s34_s20 = ssub.s32 %s591_s13, %s814_s17 }
   0xc   : > { %p99_p6 = scmp.eq.s32.totalorder %s395_s15, 1  ;;  %p37_p7 = scmp.eq.s32.totalorder %s34_s20, 0 }
   0xd   : > { %p665_p8 = por %p53_p5, %p52_p3  ;;  %p105_p10 = scmp.eq.s32.totalorder %s396_s16, 1 }
   0xe   : > { %p669_p9 = por %p99_p6, %p46_p1  ;;  %p424_p13 = scmp.lt.s32.totalorder %s595_s14, 2 }
   0xf   : > { %s674_s23 = scalar_select %p37_p7, %s583_s11, %s39_s18  }
  0x10   : > { %s800_s22 = scalar_select %p669_p9, 1, 0 }
  0x11   : > { %p676_p11 = por %p105_p10, %p52_p3  ;;  %s128_s25 = sand.u32 1, %s583_s11  }
  0x12   : > { %s399_s26 = sshll.u32 %s128_s25, 3  ;;  %s410_s27 = sshll.u32 %s591_s13, 7 }
  0x13   : > { %s801_s24 = scalar_select %p676_p11, 1, 0 }
  0x14   : > { %s687_s30 = scalar_lea.hbm %s794_s0, %s410_s27  ;;  %s132_s3 = scalar_lea.vmem [#allocation2], %s399_s26 }
  0x15   : > { %s142_s4 = sshll.u32 %s132_s3, 4  ;;  %p693_p0 = pnand %p424_p13, %p659_p4  ;;  %s689_s4 = int_to_ptr.vmem [resolvable:$true] %s142_s4 }
  0x16   : > { %s129_s6 = scalar_lea.sflag [#allocation3], %s128_s25  ;;  %s483_s7 = scalar_lea.hbm %s687_s30, 128 }
  0x17   : > { %p484_p3 = scmp.ne.s32.totalorder %s687_s30, %s483_s7  ;;  %p485_p5 = pneg %p693_p0 }
  0x18   : > { %s488_s16 = scalar_lea.hbm %s794_s0, 256  ;;  %p489_p4 = scmp.lt.u32.totalorder %s687_s30, %s794_s0 }
  0x19   : > { %p486_p6 = pnand %p485_p5, %p484_p3  ;;  %p490_p10 = scmp.lt.u32.totalorder %s488_s16, %s483_s7 }
  0x1a   : > { %p492_p12 = scmp.lt.u32.totalorder %s483_s7, %s687_s30 }
  0x1b   : > { %p487_p7 = pneg %p486_p6  ;;  %p491_p13 = por %p490_p10, %p489_p4 }
  0x1d   : > { %p493_p1 = por %p492_p12, %p491_p13 }
  0x1f   : > { %p494_p2 = pnand %p493_p1, %p487_p7 }
  0x21   : > { %497 = shalt.err (!%p494_p2)
}
  0x22   : > { %s498_s20 = scalar_lea.vmem %s689_s4, 128  ;;  %s597_s25 = smov [#allocation2]  }
  0x23   : > { %p499_p3 = scmp.ne.s32.totalorder %s689_s4, %s498_s20  ;;  %s503_s26 = sshll.u32 %s597_s25, 4  ;;  %s504_s26 = int_to_ptr.vmem [resolvable:$false] %s503_s26 }
  0x24   : > { %s505_s27 = scalar_lea.vmem %s504_s26, 256  ;;  %p506_p9 = scmp.lt.s32.totalorder %s689_s4, %s504_s26 }
  0x25   : > { %p501_p6 = pnand %p499_p3, %p485_p5  ;;  %p507_p4 = scmp.lt.s32.totalorder %s505_s27, %s498_s20 }
  0x27   : > { %p502_p11 = pneg %p501_p6  ;;  %p508_p10 = por %p507_p4, %p506_p9 }
  0x29   : > { %p509_p12 = pnand %p508_p10, %p502_p11 }
  0x2b   : > { %512 = shalt.err (!%p509_p12)
}
  0x2c   : > { %419 = dma.hbm_to_vmem [thread:$0]  (!%p693_p0), %s687_s30, 128, %s689_s4, %s129_s6  }
  0x2d   : > { %p803_p1 = scmp.lt.s32.totalorder %s595_s14, 3  ;;  %p804_p2 = scmp.ge.s32.totalorder %s595_s14, 1 }
  0x2f   : > { %p148_p5 = pnand %p804_p2, %p803_p1 }
  0x30   : > { %s729_s28 = sand.u32 (!%p148_p5), 1, %s579_s10  }
  0x31   : > { %151 = sbr.rel (%p148_p5) target bundleno = 217 (0xd9), region = 28  ;;  %s403_s29 = sshll.u32 (!%p148_p5), %s729_s28, 3 }
  0x32   : > { %s154_s3 = scalar_lea.sflag (!%p148_p5), [#allocation3], %s729_s28  ;;  %s157_s7 = scalar_lea.vmem (!%p148_p5), [#allocation2], %s403_s29 }
  0x38   : > { %566 = dma.done.wait (%p665_p8), %s154_s3, 128  }
  0x39   : > { %568 = vsyncadd (%p665_p8), %s154_s3, 4294967168  ;;  %v598_v0 = vmov 0   ;;  %v599_v1 = vmov 2   ;;  %v180_v2 = vld [vmem:[%s795_s1] sm:$0xff]  ;;  %v600_v3 = vmov 1   ;;  %v601_v4 = vmov 3  }
  0x3a   : > { %478 = vset.pattern.permute.xlu0 %v598_v0  ;;  %480 = vset.pattern.permute.xlu1 %v599_v1  ;;  %v188_v5 = vlaneseq  ;;  %v181_v11 = vld [vmem:[%s157_s7] sm:$0xff]  ;;  %s404_s21 = sshll.u32 %s729_s28, 4  ;;  %s411_s5 = sshll.u32 %s587_s12, 8 }
  0x3b   : > { %184 = vperm.xlu0 %478, %v180_v2   ;;  %235 = vperm.xlu1 %480, %v180_v2   ;;  %s177_s6 = scalar_lea.vmem [#allocation5], %s404_s21  ;;  %s745_s18 = scalar_lea.hbm %s796_s2, %s411_s5 }
  0x3c   : > { %v189_v6 = vshrl.u32 %v188_v5, 7  ;;  %s311_s8 = sshll.u32 %s177_s6, 4  ;;  %s295_s12 = scalar_lea.sflag [#allocation4], %s729_s28  ;;  %s747_s8 = int_to_ptr.vmem [resolvable:$true] %s311_s8 }
  0x3d   : > { %s513_s19 = scalar_lea.vmem %s747_s8, 256  ;;  %p805_p9 = scmp.ne.s32.totalorder %s800_s22, 0 }
  0x3e   : > { %v190_v7 = vsub.s32 0, %v189_v6  ;;  %v194_v8 = vsub.s32 4, %v189_v6  ;;  %v214_v9 = vsub.s32 1, %v189_v6  ;;  %v218_v10 = vsub.s32 5, %v189_v6  ;;  %p514_p8 = scmp.ne.s32.totalorder %s747_s8, %s513_s19  ;;  %s602_s20 = smov [#allocation5]  }
  0x3f   : > { %479 = vset.pattern.permute.xlu0 %v600_v3  ;;  %481 = vset.pattern.permute.xlu1 %v601_v4  ;;  %v240_v12 = vsub.s32 2, %v189_v6  ;;  %v244_v13 = vsub.s32 6, %v189_v6  ;;  %v266_v14 = vsub.s32 3, %v189_v6  ;;  %v270_v15 = vsub.s32 7, %v189_v6  ;;  %s517_s25 = sshll.u32 %s602_s20, 4  ;;  %s518_s25 = int_to_ptr.vmem [resolvable:$false] %s517_s25 }
  0x40   : > { %209 = vperm.xlu0 %479, %v180_v2   ;;  %261 = vperm.xlu1 %481, %v180_v2   ;;  %v191_v16 = vrot.slane %v181_v11, %v190_v7  ;;  %v195_v17 = vrot.slane %v181_v11, %v194_v8  ;;  %v215_v18 = vrot.slane %v181_v11, %v214_v9  ;;  %p515_p11 = pnand %p514_p8, %p805_p9  ;;  %s519_s26 = scalar_lea.vmem %s518_s25, 512 }
  0x41   : > { %v219_v19 = vrot.slane %v181_v11, %v218_v10  ;;  %v241_v20 = vrot.slane %v181_v11, %v240_v12  ;;  %v245_v21 = vrot.slane %v181_v11, %v244_v13  ;;  %v267_v24 = vrot.slane %v181_v11, %v266_v14  ;;  %p520_p7 = scmp.lt.s32.totalorder %s747_s8, %s518_s25  ;;  %p521_p13 = scmp.lt.s32.totalorder %s519_s26, %s513_s19 }
  0x42   : > { %v271_v25 = vrot.slane %v181_v11, %v270_v15  ;;  %v201_v26 = vrot.slane %v191_v16, %v190_v7  ;;  %v205_v27 = vrot.slane %v195_v17, %v190_v7  ;;  %v225_v28 = vrot.slane %v215_v18, %v214_v9  ;;  %p516_p0 = pneg %p515_p11 }
  0x43   : > { %v229_v29 = vrot.slane %v219_v19, %v214_v9  ;;  %v251_v30 = vrot.slane %v241_v20, %v240_v12  ;;  %v255_v31 = vrot.slane %v245_v21, %v240_v12  ;;  %v277_v32 = vrot.slane %v267_v24, %v266_v14  ;;  %p522_p3 = por %p521_p13, %p520_p7 }
  0x44   : > { %482 = vset.pattern.permute.xlu0 %v601_v4  ;;  %v281_v33 = vrot.slane %v271_v25, %v266_v14 }
  0x45   : > { %p523_p6 = pnand %p522_p3, %p516_p0 }
  0xba   : > { %v185_v22 = vpop.permute.xlu0 %184  ;;  %v236_v23 = vpop.permute.xlu1 %235 }
  0xbb   : > { %v206_v36 = vmul.f32 %v201_v26, %v185_v22  ;;  %v207_v37 = vmul.f32 %v205_v27, %v185_v22  ;;  %v256_v40 = vmul.f32 %v251_v30, %v236_v23  ;;  %v257_v41 = vmul.f32 %v255_v31, %v236_v23 }
  0xbf   : > { %v210_v34 = vpop.permute.xlu0 %209  ;;  %v262_v35 = vpop.permute.xlu1 %261 }
  0xc0   : > { %v230_v38 = vmul.f32 %v225_v28, %v210_v34  ;;  %v231_v39 = vmul.f32 %v229_v29, %v210_v34  ;;  %v282_v44 = vmul.f32 %v277_v32, %v262_v35  ;;  %v283_v45 = vmul.f32 %v281_v33, %v262_v35 }
  0xc2   : > { %v232_v42 = vadd.f32 %v230_v38, %v206_v36  ;;  %v233_v43 = vadd.f32 %v231_v39, %v207_v37 }
  0xc4   : > { %v258_v46 = vadd.f32 %v256_v40, %v232_v42  ;;  %v259_v47 = vadd.f32 %v257_v41, %v233_v43 }
  0xc6   : > { %v284_v48 = vadd.f32 %v282_v44, %v258_v46  ;;  %v285_v49 = vadd.f32 %v283_v45, %v259_v47 }
  0xc8   : > { %vm286_vm0 = vcmp.ge.f32.partialorder %v284_v48, 0.0  ;;  %vm287_vm1 = vcmp.ge.f32.partialorder %v285_v49, 0.0  ;;  %v288_v50 = vmul.f32 0.2, %v284_v48  ;;  %v289_v51 = vmul.f32 0.2, %v285_v49 }
  0xca   : > { %v290_v52 = vsel %vm286_vm0, %v284_v48, %v288_v50  ;;  %v291_v53 = vsel %vm287_vm1, %v285_v49, %v289_v51 }
  0xcb   : > { %292 = vst [vmem:[%s177_s6] sm:$0xff] %v290_v52  ;;  %293 = vst [vmem:[%s177_s6 + $0x8] sm:$0xff] %v291_v53 }
  0xcc   : > { %526 = shalt.err (!%p523_p6)
}
  0xcd   : > { %s527_s27 = scalar_lea.hbm %s745_s18, 256  ;;  %s531_s3 = scalar_lea.hbm %s796_s2, 512 }
  0xce   : > { %p528_p4 = scmp.ne.s32.totalorder %s745_s18, %s527_s27  ;;  %p532_p1 = scmp.lt.u32.totalorder %s745_s18, %s796_s2 }
  0xcf   : > { %p533_p2 = scmp.lt.u32.totalorder %s531_s3, %s527_s27  ;;  %p535_p8 = scmp.lt.u32.totalorder %s527_s27, %s745_s18 }
  0xd0   : > { %p529_p10 = pnand %p528_p4, %p805_p9 }
  0xd1   : > { %p534_p5 = por %p533_p2, %p532_p1 }
  0xd2   : > { %p530_p12 = pneg %p529_p10 }
  0xd3   : > { %p536_p11 = por %p535_p8, %p534_p5 }
  0xd5   : > { %p537_p0 = pnand %p536_p11, %p530_p12 }
  0xd7   : > { %540 = shalt.err (!%p537_p0)
}
  0xd8   : > { %414 = dma.vmem_to_hbm [thread:$0]  (%p805_p9), %s747_s8, 256, %s745_s18, %s295_s12  }
  0xd9 PF: > { %s323_s4 = sand.u32 1, %s575_s9   ;;  %p806_p7 = scmp.ne.s32.totalorder %s801_s24, 0 }
  0xda   : > { %p807_p13 = scmp.ge.s32.totalorder %s595_s14, 2  ;;  %s324_s21 = scalar_lea.sflag [#allocation4], %s323_s4 }
  0xdc   : > { %p421_p3 = pnand %p807_p13, %p806_p7 }
  0xde   : > { %570 = dma.done.wait (!%p421_p3), %s324_s21, 256  }
  0xdf   : > { %572 = vsyncadd (!%p421_p3), %s324_s21, 4294967040  ;;  %s18_s14 = sadd.s32 1, %s595_s14   ;;  %s808_s9 = smov %s579_s10 }
  0xe0   : > { %p15_p6 = scmp.ge.s32.totalorder %s18_s14, 4   ;;  %s809_s10 = smov %s583_s11 }
  0xe1   : > { %s810_s11 = smov %s674_s23  ;;  %s811_s12 = smov %s591_s13 }
  0xe2   : > { %s812_s13 = smov %s814_s17  ;;  %17 = sbr.rel (!%p15_p6) target bundleno = 6 (0x6), region = 73 }
  0xe9   :  { %329 = vsyncpa [#allocation3], 1 }
  0xea   :  { %331 = vsyncpa [#allocation3 + $0x1], 1 }
  0xeb   :  { %332 = vsyncpa [#allocation4], 1 }
  0xec   :  { %334 = vsyncpa [#allocation4 + $0x1], 1 }

</bundles_post_ra>
